<compile_context>
chip_gen: v7x
topology: tpu7x:2x2x1
jax: 0.10.0
libtpu: 0.0.40
codegen_flags: <defaults>
</compile_context>

<pallas_src>
import functools

import jax
import jax.numpy as jnp
from jax import lax
from jax.experimental import pallas as pl
from jax.experimental.pallas import tpu as pltpu

LANE = 128
SUBLANE = 8
NCORES = 2                       # leading "parallel" grid axis (megacore split on v7x)
TILE_BYTES = 4 * 1024 * 1024     # per input, per pipeline buffer
VMEM_LIMIT_BYTES = 40 * 1024 * 1024


def _dice_bce_kernel(x_ref, t_ref, o_ref, *, n, tile_rows, steps_per_core, any_mask):
    c = pl.program_id(0)   # core-split axis
    i = pl.program_id(1)   # streaming / reduction axis

    @pl.when(i == 0)
    def _():
        o_ref[...] = jnp.zeros_like(o_ref)

    x = x_ref[...].astype(jnp.float32)
    t = t_ref[...].astype(jnp.float32)

    # Shared transcendentals (3 EUP ops/element: exp, log1p, recip).
    e = jnp.exp(-jnp.abs(x))
    lp = jnp.log1p(e)
    inv = 1.0 / (1.0 + e)                      # exact reciprocal (1e-5 parity)
    p = jnp.where(x >= 0.0, inv, e * inv)      # sigmoid(x)
    # -log(sigmoid(x)) = softplus(-x) = max(-x,0)+lp ; -log(1-sigmoid(x)) = softplus(x);
    # clamp each at 100 to mirror torch's binary_cross_entropy -100 log clamp.
    neg_log_p = jnp.minimum(jnp.maximum(-x, 0.0) + lp, 100.0)
    neg_log_1mp = jnp.minimum(jnp.maximum(x, 0.0) + lp, 100.0)
    bce = t * neg_log_p + (1.0 - t) * neg_log_1mp
    inter = p * t

    nsub = tile_rows // SUBLANE

    def fold(v):
        # (tile_rows, 128) -> (8, 128): vreg-wise VPU adds only, no XLU fold.
        return jnp.sum(v.reshape(nsub, SUBLANE, LANE), axis=0)

    def accumulate(inter_, p_, t_, bce_):
        o_ref[0:8, :] += fold(inter_)      # sum(sigmoid(x) * t)
        o_ref[8:16, :] += fold(p_)         # sum(sigmoid(x))
        o_ref[16:24, :] += fold(t_)        # sum(t)
        o_ref[24:32, :] += fold(bce_)      # sum(per-element BCE)

    if any_mask:
        tile_elems = tile_rows * LANE
        tile_start = (c * steps_per_core + i) * tile_elems

        @pl.when(tile_start + tile_elems <= n)
        def _():
            accumulate(inter, p, t, bce)   # full tile: zero mask overhead

        @pl.when(tile_start + tile_elems > n)
        def _():
            ridx = lax.broadcasted_iota(jnp.int32, x.shape, 0)
            cidx = lax.broadcasted_iota(jnp.int32, x.shape, 1)
            valid = (tile_start + ridx * LANE + cidx) < n
            zero = jnp.zeros_like(p)
            accumulate(
                jnp.where(valid, inter, zero),
                jnp.where(valid, p, zero),
                jnp.where(valid, t, zero),
                jnp.where(valid, bce, zero),
            )
    else:
        accumulate(inter, p, t, bce)


def dice_bce_loss(inputs, targets, smooth=1.0, *, max_tile_rows=None):
    """Pallas implementation of DiceBCELoss.forward (returns scalar f32)."""
    x = inputs.reshape(-1)
    t = targets.reshape(-1)
    n = int(x.shape[0])

    # Pad to a multiple of (8,128) elements so the row count is a multiple of 8;
    # padded lanes are masked in-kernel against the true n (values irrelevant).
    chunk = SUBLANE * LANE
    pad = (-n) % chunk
    if pad:
        x = jnp.pad(x, (0, pad))
        t = jnp.pad(t, (0, pad))
    rows = (n + pad) // LANE

    x2 = x.reshape(rows, LANE)
    t2 = t.reshape(rows, LANE)

    # Biggest lane-dense tile within the per-buffer byte budget, scaled by the
    # streamed (native) dtype width; inputs are upcast to f32 inside the kernel.
    itemsize = max(x2.dtype.itemsize, t2.dtype.itemsize)
    budget_rows = max(SUBLANE, (TILE_BYTES // (LANE * itemsize)) // SUBLANE * SUBLANE)
    if max_tile_rows is not None:   # test hook: force a small multi-block grid
        budget_rows = min(budget_rows, max(SUBLANE, (max_tile_rows // SUBLANE) * SUBLANE))
    tile_rows = int(min(budget_rows, rows))

    total_blocks = pl.cdiv(rows, tile_rows)
    ncores = min(NCORES, total_blocks)
    steps_per_core = pl.cdiv(total_blocks, ncores)
    covered = ncores * steps_per_core * tile_rows * LANE
    any_mask = covered != n

    if ncores * steps_per_core == total_blocks:
        def in_map(c, i):
            return (c * steps_per_core + i, 0)
    else:
        # Grid overshoots by < ncores blocks: clamp to the last real block; the
        # in-kernel mask zeroes any contribution from duplicated blocks.
        last_block = total_blocks - 1

        def in_map(c, i):
            return (jnp.minimum(c * steps_per_core + i, last_block), 0)

    kernel = functools.partial(
        _dice_bce_kernel,
        n=n,
        tile_rows=tile_rows,
        steps_per_core=int(steps_per_core),
        any_mask=bool(any_mask),
    )

    out = pl.pallas_call(
        kernel,
        out_shape=jax.ShapeDtypeStruct((ncores * 32, LANE), jnp.float32),
        grid_spec=pltpu.PrefetchScalarGridSpec(
            num_scalar_prefetch=0,
            grid=(ncores, steps_per_core),
            in_specs=[
                pl.BlockSpec((tile_rows, LANE), in_map),
                pl.BlockSpec((tile_rows, LANE), in_map),
            ],
            out_specs=pl.BlockSpec((32, LANE), lambda c, i: (c, 0)),
        ),
        compiler_params=pltpu.CompilerParams(
            dimension_semantics=("parallel", "arbitrary"),
            vmem_limit_bytes=VMEM_LIMIT_BYTES,
        ),
        cost_estimate=pl.CostEstimate(
            flops=12 * n,
            transcendentals=3 * n,
            bytes_accessed=n * (x2.dtype.itemsize + t2.dtype.itemsize)
            + ncores * 32 * LANE * 4,
        ),
    )(x2, t2)

    # Tiny final combine (per-core, per-lane, per-sublane partials -> 4 scalars).
    sums = out.reshape(ncores, 4, SUBLANE, LANE).sum(axis=(0, 2, 3))
    intersection, sum_p, sum_t, sum_bce = sums[0], sums[1], sums[2], sums[3]
    smooth = jnp.float32(smooth)
    dice_loss = 1.0 - (2.0 * intersection + smooth) / (sum_p + sum_t + smooth)
    bce_mean = sum_bce / jnp.float32(n)
    return bce_mean + dice_loss


def _dice_bce_ref(inputs, targets, smooth=1.0):
    # Pure-JAX reference (raw logs: fine for the moderate logits used in tests).
    p = jax.nn.sigmoid(inputs.astype(jnp.float32)).reshape(-1)
    t = targets.astype(jnp.float32).reshape(-1)
    intersection = jnp.sum(p * t)
    dice_loss = 1.0 - (2.0 * intersection + smooth) / (jnp.sum(p) + jnp.sum(t) + smooth)
    bce = jnp.mean(-(t * jnp.log(p) + (1.0 - t) * jnp.log(1.0 - p)))
    return bce + dice_loss


if __name__ == "__main__":
    key = jax.random.PRNGKey(0)
    k1, k2, k3, k4, k5, k6 = jax.random.split(key, 6)

    # 1) NCHW logits + binary targets (numel multiple of 1024 -> unmasked path).
    inputs = jax.random.normal(k1, (2, 4, 16, 16), dtype=jnp.float32)
    targets = (jax.random.uniform(k2, (2, 4, 16, 16)) > 0.5).astype(jnp.float32)
    loss = dice_bce_loss(inputs, targets, smooth=1.0)
    jax.block_until_ready(loss)
    ref = _dice_bce_ref(inputs, targets, smooth=1.0)
    assert jnp.allclose(loss, ref, atol=1e-5, rtol=1e-5), (loss, ref)

    # 2) Ragged numel (exercises padding + boundary-tile masking).
    inputs2 = jax.random.normal(k3, (2, 3, 7, 5), dtype=jnp.float32)
    targets2 = (jax.random.uniform(k4, (2, 3, 7, 5)) > 0.5).astype(jnp.float32)
    loss2 = dice_bce_loss(inputs2, targets2, smooth=1.0)
    jax.block_until_ready(loss2)
    ref2 = _dice_bce_ref(inputs2, targets2, smooth=1.0)
    assert jnp.allclose(loss2, ref2, atol=1e-5, rtol=1e-5), (loss2, ref2)

    # 3) Multi-block, 2-"core" grid, partial last block (small tile override).
    inputs3 = jax.random.normal(k5, (4, 4, 32, 32), dtype=jnp.float32)
    targets3 = (jax.random.uniform(k6, (4, 4, 32, 32)) > 0.5).astype(jnp.float32)
    loss3 = dice_bce_loss(inputs3, targets3, smooth=1.0, max_tile_rows=24)
    jax.block_until_ready(loss3)
    ref3 = _dice_bce_ref(inputs3, targets3, smooth=1.0)
    assert jnp.allclose(loss3, ref3, atol=1e-4, rtol=1e-5), (loss3, ref3)

    print("KERNEL_OK")
</pallas_src>

<mosaic_0001>
module attributes {stable_mosaic.version = 11 : i64} {
  func.func @_dice_bce_kernel(%arg0: i32, %arg1: i32, %arg2: memref<16x128xf32, #tpu.memory_space<vmem>>, %arg3: memref<16x128xf32, #tpu.memory_space<vmem>>, %arg4: memref<32x128xf32, #tpu.memory_space<vmem>>) attributes {dimension_semantics = [#tpu.dimension_semantics<parallel>, #tpu.dimension_semantics<arbitrary>], iteration_bounds = array<i64: 1, 1>, scalar_prefetch = 0 : i64, scratch_operands = 0 : i64, tpu.core_type = #tpu.core_type<tc>, window_params = [{transform_indices = @transform_0, window_bounds = array<i64: 16, 128>}, {transform_indices = @transform_1, window_bounds = array<i64: 16, 128>}, {transform_indices = @transform_2, window_bounds = array<i64: 32, 128>}]} {
    %c0_i32 = arith.constant 0 : i32
    %0 = arith.cmpi eq, %arg1, %c0_i32 : i32
    %1 = arith.extui %0 : i1 to i32
    %c0_i32_0 = arith.constant 0 : i32
    %2 = arith.cmpi ne, %1, %c0_i32_0 : i32
    scf.if %2 {
      %cst_30 = arith.constant 0.000000e+00 : f32
      %56 = vector.broadcast %cst_30 : f32 to vector<32x128xf32>
      %c0_31 = arith.constant 0 : index
      %c0_32 = arith.constant 0 : index
      %57 = vector.load %arg4[%c0_31, %c0_32] : memref<32x128xf32, #tpu.memory_space<vmem>>, vector<32x128xf32>
      tpu.vector_store %arg4[%c0_31, %c0_32], %56 {strides = array<i32>} : memref<32x128xf32, #tpu.memory_space<vmem>>, vector<32x128xf32>,
    } else {
    }
    %c0 = arith.constant 0 : index
    %c0_1 = arith.constant 0 : index
    %3 = vector.load %arg2[%c0, %c0_1] : memref<16x128xf32, #tpu.memory_space<vmem>>, vector<16x128xf32>
    %c0_2 = arith.constant 0 : index
    %c0_3 = arith.constant 0 : index
    %4 = vector.load %arg3[%c0_2, %c0_3] : memref<16x128xf32, #tpu.memory_space<vmem>>, vector<16x128xf32>
    %5 = math.absf %3 : vector<16x128xf32>
    %cst = arith.constant 0.000000e+00 : f32
    %6 = vector.broadcast %cst : f32 to vector<16x128xf32>
    %7 = arith.subf %6, %5 : vector<16x128xf32>
    %8 = math.exp %7 : vector<16x128xf32>
    %9 = math.log1p %8 : vector<16x128xf32>
    %cst_4 = arith.constant 1.000000e+00 : f32
    %10 = vector.broadcast %cst_4 : f32 to vector<16x128xf32>
    %11 = arith.addf %10, %8 : vector<16x128xf32>
    %cst_5 = arith.constant 1.000000e+00 : f32
    %12 = vector.broadcast %cst_5 : f32 to vector<16x128xf32>
    %13 = arith.divf %12, %11 : vector<16x128xf32>
    %cst_6 = arith.constant 0.000000e+00 : f32
    %14 = vector.broadcast %cst_6 : f32 to vector<16x128xf32>
    %15 = arith.cmpf oge, %3, %14 : vector<16x128xf32>
    %16 = arith.mulf %8, %13 : vector<16x128xf32>
    %17 = arith.select %15, %13, %16 : vector<16x128xi1>, vector<16x128xf32>
    %cst_7 = arith.constant 0.000000e+00 : f32
    %18 = vector.broadcast %cst_7 : f32 to vector<16x128xf32>
    %19 = arith.subf %18, %3 : vector<16x128xf32>
    %cst_8 = arith.constant 0.000000e+00 : f32
    %20 = vector.broadcast %cst_8 : f32 to vector<16x128xf32>
    %21 = arith.maximumf %19, %20 : vector<16x128xf32>
    %22 = arith.addf %21, %9 : vector<16x128xf32>
    %cst_9 = arith.constant 1.000000e+02 : f32
    %23 = vector.broadcast %cst_9 : f32 to vector<16x128xf32>
    %24 = arith.minimumf %22, %23 : vector<16x128xf32>
    %cst_10 = arith.constant 0.000000e+00 : f32
    %25 = vector.broadcast %cst_10 : f32 to vector<16x128xf32>
    %26 = arith.maximumf %3, %25 : vector<16x128xf32>
    %27 = arith.addf %26, %9 : vector<16x128xf32>
    %cst_11 = arith.constant 1.000000e+02 : f32
    %28 = vector.broadcast %cst_11 : f32 to vector<16x128xf32>
    %29 = arith.minimumf %27, %28 : vector<16x128xf32>
    %30 = arith.mulf %4, %24 : vector<16x128xf32>
    %cst_12 = arith.constant 1.000000e+00 : f32
    %31 = vector.broadcast %cst_12 : f32 to vector<16x128xf32>
    %32 = arith.subf %31, %4 : vector<16x128xf32>
    %33 = arith.mulf %32, %29 : vector<16x128xf32>
    %34 = arith.addf %30, %33 : vector<16x128xf32>
    %35 = arith.mulf %17, %4 : vector<16x128xf32>
    %c0_13 = arith.constant 0 : index
    %c0_14 = arith.constant 0 : index
    %36 = vector.load %arg4[%c0_13, %c0_14] : memref<32x128xf32, #tpu.memory_space<vmem>>, vector<8x128xf32>
    %37 = vector.shape_cast %35 : vector<16x128xf32> to vector<2x8x128xf32>
    %cst_15 = arith.constant dense<0.000000e+00> : vector<8x128xf32>
    %38 = vector.multi_reduction <add>, %37, %cst_15 [0] : vector<2x8x128xf32> to vector<8x128xf32>
    %39 = arith.addf %36, %38 : vector<8x128xf32>
    %c0_16 = arith.constant 0 : index
    %c0_17 = arith.constant 0 : index
    %40 = vector.load %arg4[%c0_16, %c0_17] : memref<32x128xf32, #tpu.memory_space<vmem>>, vector<8x128xf32>
    tpu.vector_store %arg4[%c0_16, %c0_17], %39 {strides = array<i32>} : memref<32x128xf32, #tpu.memory_space<vmem>>, vector<8x128xf32>,
    %c8 = arith.constant 8 : index
    %c0_18 = arith.constant 0 : index
    %41 = vector.load %arg4[%c8, %c0_18] : memref<32x128xf32, #tpu.memory_space<vmem>>, vector<8x128xf32>
    %42 = vector.shape_cast %17 : vector<16x128xf32> to vector<2x8x128xf32>
    %cst_19 = arith.constant dense<0.000000e+00> : vector<8x128xf32>
    %43 = vector.multi_reduction <add>, %42, %cst_19 [0] : vector<2x8x128xf32> to vector<8x128xf32>
    %44 = arith.addf %41, %43 : vector<8x128xf32>
    %c8_20 = arith.constant 8 : index
    %c0_21 = arith.constant 0 : index
    %45 = vector.load %arg4[%c8_20, %c0_21] : memref<32x128xf32, #tpu.memory_space<vmem>>, vector<8x128xf32>
    tpu.vector_store %arg4[%c8_20, %c0_21], %44 {strides = array<i32>} : memref<32x128xf32, #tpu.memory_space<vmem>>, vector<8x128xf32>,
    %c16 = arith.constant 16 : index
    %c0_22 = arith.constant 0 : index
    %46 = vector.load %arg4[%c16, %c0_22] : memref<32x128xf32, #tpu.memory_space<vmem>>, vector<8x128xf32>
    %47 = vector.shape_cast %4 : vector<16x128xf32> to vector<2x8x128xf32>
    %cst_23 = arith.constant dense<0.000000e+00> : vector<8x128xf32>
    %48 = vector.multi_reduction <add>, %47, %cst_23 [0] : vector<2x8x128xf32> to vector<8x128xf32>
    %49 = arith.addf %46, %48 : vector<8x128xf32>
    %c16_24 = arith.constant 16 : index
    %c0_25 = arith.constant 0 : index
    %50 = vector.load %arg4[%c16_24, %c0_25] : memref<32x128xf32, #tpu.memory_space<vmem>>, vector<8x128xf32>
    tpu.vector_store %arg4[%c16_24, %c0_25], %49 {strides = array<i32>} : memref<32x128xf32, #tpu.memory_space<vmem>>, vector<8x128xf32>,
    %c24 = arith.constant 24 : index
    %c0_26 = arith.constant 0 : index
    %51 = vector.load %arg4[%c24, %c0_26] : memref<32x128xf32, #tpu.memory_space<vmem>>, vector<8x128xf32>
    %52 = vector.shape_cast %34 : vector<16x128xf32> to vector<2x8x128xf32>
    %cst_27 = arith.constant dense<0.000000e+00> : vector<8x128xf32>
    %53 = vector.multi_reduction <add>, %52, %cst_27 [0] : vector<2x8x128xf32> to vector<8x128xf32>
    %54 = arith.addf %51, %53 : vector<8x128xf32>
    %c24_28 = arith.constant 24 : index
    %c0_29 = arith.constant 0 : index
    %55 = vector.load %arg4[%c24_28, %c0_29] : memref<32x128xf32, #tpu.memory_space<vmem>>, vector<8x128xf32>
    tpu.vector_store %arg4[%c24_28, %c0_29], %54 {strides = array<i32>} : memref<32x128xf32, #tpu.memory_space<vmem>>, vector<8x128xf32>,
    return
  }
  func.func @transform_0(%arg0: i32, %arg1: i32) -> (i32, i32) {
    %c1_i32 = arith.constant 1 : i32
    %0 = arith.muli %arg0, %c1_i32 : i32
    %1 = arith.addi %0, %arg1 : i32
    %c0_i32 = arith.constant 0 : i32
    %c0_i32_0 = arith.constant 0 : i32
    return %1, %c0_i32 : i32, i32
  }
  func.func @transform_1(%arg0: i32, %arg1: i32) -> (i32, i32) {
    %c1_i32 = arith.constant 1 : i32
    %0 = arith.muli %arg0, %c1_i32 : i32
    %1 = arith.addi %0, %arg1 : i32
    %c0_i32 = arith.constant 0 : i32
    %c0_i32_0 = arith.constant 0 : i32
    return %1, %c0_i32 : i32, i32
  }
  func.func @transform_2(%arg0: i32, %arg1: i32) -> (i32, i32) {
    %c0_i32 = arith.constant 0 : i32
    %c0_i32_0 = arith.constant 0 : i32
    return %arg0, %c0_i32 : i32, i32
  }
}

</mosaic_0001>

<bundles_post_ra>
// kernel: tpu_custom_call.1
= control target key start
LH: loop header
LB: loop body
LE: loop exit
PB: predicated region body
PF: predicated region fallthrough
CT: control target
= control target key end

     0   :  { %7 = vsyncpa [#allocation3], 0  ;;  %s328_s0 = inlined_call_operand.hbm [shape: f32[16,128], index: 0, kind: input, shape index: {}]   ;;  %s329_s1 = inlined_call_operand.hbm [shape: f32[16,128], index: 1, kind: input, shape index: {}]   ;;  %s330_s2 = inlined_call_operand.hbm [shape: f32[32,128], index: 2, kind: output, shape index: {}]  }
   0x1   :  { %8 = vsyncpa [#allocation6], 0 }
   0x2   :  { %9 = vsyncpa [#allocation4], 0  ;;  %s250_s9 = smov [#allocation2]   ;;  %s178_s13 = scalar_lea.hbm %s328_s0, 256 }
   0x3   :  { %s19_s10 = sshll.u32 %s250_s9, 4  ;;  %p179_p0 = scmp.ne.s32.totalorder %s328_s0, %s178_s13  ;;  %s20_s10 = int_to_ptr.vmem [resolvable:$true] %s19_s10 }
   0x4   :  { %p182_p1 = scmp.lt.u32.totalorder %s178_s13, %s328_s0 }
   0x6   :  { %p184_p2 = pnand %p182_p1, %p179_p0 }
   0x8   :  { %187 = shalt.err (!%p184_p2)
}
   0x9   :  { %s188_s18 = scalar_lea.vmem %s20_s10, 256  ;;  %p193_p4 = scmp.lt.s32.totalorder %s20_s10, %s20_s10 }
   0xa   :  { %p189_p3 = scmp.ne.s32.totalorder %s20_s10, %s188_s18  ;;  %p194_p5 = scmp.lt.s32.totalorder %s188_s18, %s188_s18 }
   0xc   :  { %p195_p6 = por %p194_p5, %p193_p4 }
   0xe   :  { %p196_p7 = pnand %p195_p6, %p189_p3 }
  0x10   :  { %199 = shalt.err (!%p196_p7)
}
  0x11   :  { %s251_s19 = smov 128   ;;  %s252_s20 = smov 8  }
  0x12   :  { %25 = dma.hbm_to_vmem [thread:$0]  %s328_s0, 256, %s20_s10, [#allocation3], %s251_s19, %s251_s19, %s252_s20  }
  0x13   :  { %s253_s23 = smov [#allocation5]   ;;  %s200_s27 = scalar_lea.hbm %s329_s1, 256 }
  0x14   :  { %s35_s24 = sshll.u32 %s253_s23, 4  ;;  %p201_p8 = scmp.ne.s32.totalorder %s329_s1, %s200_s27  ;;  %s36_s24 = int_to_ptr.vmem [resolvable:$true] %s35_s24 }
  0x15   :  { %p204_p9 = scmp.lt.u32.totalorder %s200_s27, %s329_s1 }
  0x17   :  { %p206_p10 = pnand %p204_p9, %p201_p8 }
  0x19   :  { %209 = shalt.err (!%p206_p10)
}
  0x1a   :  { %s210_s4 = scalar_lea.vmem %s36_s24, 256  ;;  %p215_p12 = scmp.lt.s32.totalorder %s36_s24, %s36_s24 }
  0x1b   :  { %p211_p11 = scmp.ne.s32.totalorder %s36_s24, %s210_s4  ;;  %p216_p13 = scmp.lt.s32.totalorder %s210_s4, %s210_s4 }
  0x1d   :  { %p217_p0 = por %p216_p13, %p215_p12 }
  0x1f   :  { %p218_p1 = pnand %p217_p0, %p211_p11 }
  0x21   :  { %221 = shalt.err (!%p218_p1)
}
  0x22   :  { %41 = dma.hbm_to_vmem [thread:$0]  %s329_s1, 256, %s36_s24, [#allocation6], %s251_s19, %s251_s19, %s252_s20  }
  0x23   :  { %244 = dma.done.wait [#allocation3], 256  }
  0x24   :  { %245 = vsyncadd [#allocation3], 4294967040 }
  0x25   :  { %246 = dma.done.wait [#allocation6], 256  }
  0x26   :  { %247 = vsyncadd [#allocation6], 4294967040  ;;  %v60_v0 = vld [vmem:[#allocation2] sm:$0xff]  ;;  %v61_v1 = vld [vmem:[#allocation2 + $0x8] sm:$0xff]  ;;  %s254_s1 = smov [#allocation7]  }
  0x27   :  { %v300_v2 = vld [vmem:[#allocation5] sm:$0xff]  ;;  %v302_v3 = vld [vmem:[#allocation5 + $0x8] sm:$0xff]  ;;  %v64_v4 = vand.u32 2147483647, %v60_v0  ;;  %v65_v5 = vand.u32 2147483647, %v61_v1 }
  0x28   :  { %v135_v6 = vadd.f32 %v302_v3, %v300_v2  ;;  %v102_v20 = vsub.f32 0.0, %v60_v0  ;;  %v103_v22 = vsub.f32 0.0, %v61_v1  ;;  %vm96_vm0 = vcmp.ge.f32.partialorder %v60_v0, 0.0  ;;  %s147_s6 = sshll.u32 %s254_s1, 4  ;;  %s148_s6 = int_to_ptr.vmem [resolvable:$true] %s147_s6 }
  0x29   :  { %v66_v7 = vsub.f32 0.0, %v64_v4  ;;  %v67_v8 = vsub.f32 0.0, %v65_v5  ;;  %vm97_vm1 = vcmp.ge.f32.partialorder %v61_v1, 0.0  ;;  %v110_v27 = vmax.f32 %v60_v0, 0.0  ;;  %s222_s7 = scalar_lea.vmem %s148_s6, 512  ;;  %p227_p3 = scmp.lt.s32.totalorder %s148_s6, %s148_s6 }
  0x2a   :  { %137 = vst [vmem:[#allocation7 + $0x10] sm:$0xff] %v135_v6  ;;  %v111_v28 = vmax.f32 %v61_v1, 0.0  ;;  %v104_v32 = vmax.f32 %v102_v20, 0.0  ;;  %v105_v36 = vmax.f32 %v103_v22, 0.0  ;;  %v118_v43 = vsub.f32 1.0, %v300_v2  ;;  %p223_p2 = scmp.ne.s32.totalorder %s148_s6, %s222_s7  ;;  %p228_p4 = scmp.lt.s32.totalorder %s222_s7, %s222_s7 }
  0x2b   :  { %v68_v9 = vmul.f32 1.442695, %v66_v7  ;;  %v70_v10 = vmul.f32 1.442695, %v67_v8  ;;  %v119_v47 = vsub.f32 1.0, %v302_v3 }
  0x2c   :  { %p229_p5 = por %p228_p4, %p227_p3 }
  0x2d   :  { %166 = vpow2.f32 %v68_v9 }
  0x2e   :  { %168 = vpow2.f32 %v70_v10  ;;  %p230_p6 = pnand %p229_p5, %p223_p2 }
  0x37   :  { %v167_v11 = vpop.eup %166 }
  0x38   :  { %v169_v12 = vpop.eup %168  ;;  %v72_v13 = vadd.f32 1.0, %v167_v11  ;;  %v75_v15 = vmul.f32 -0.5, %v167_v11  ;;  %v78_v18 = vand.u32 2147483647, %v167_v11 }
  0x39   :  { %v81_v14 = vadd.f32 1.0, %v169_v12  ;;  %v84_v16 = vmul.f32 -0.5, %v169_v12  ;;  %v87_v21 = vand.u32 2147483647, %v169_v12 }
  0x3a   :  { %170 = vrcp.f32 %v72_v13  ;;  %v76_v17 = vadd.f32 1.0, %v75_v15  ;;  %vm79_vm2 = vcmp.lt.f32.partialorder %v78_v18, 0.0004427343 }
  0x3b   :  { %172 = vrcp.f32 %v81_v14  ;;  %v85_v19 = vadd.f32 1.0, %v84_v16  ;;  %vm88_vm3 = vcmp.lt.f32.partialorder %v87_v21, 0.0004427343 }
  0x3c   :  { %174 = vlog2.f32 %v72_v13  ;;  %v77_v26 = vmul.f32 %v167_v11, %v76_v17 }
  0x3d   :  { %176 = vlog2.f32 %v81_v14  ;;  %v86_v31 = vmul.f32 %v169_v12, %v85_v19 }
  0x44   :  { %v171_v23 = vpop.eup %170 }
  0x45   :  { %v173_v24 = vpop.eup %172  ;;  %v98_v25 = vmul.f32 %v171_v23, %v167_v11 }
  0x46   :  { %v175_v29 = vpop.eup %174  ;;  %v99_v30 = vmul.f32 %v173_v24, %v169_v12 }
  0x47   :  { %v177_v33 = vpop.eup %176  ;;  %v100_v34 = vsel %vm96_vm0, %v171_v23, %v98_v25  ;;  %v74_v35 = vmul.f32 0.6931472, %v175_v29 }
  0x48   :  { %v101_v37 = vsel %vm97_vm1, %v173_v24, %v99_v30  ;;  %v124_v38 = vmul.f32 %v100_v34, %v300_v2  ;;  %v83_v39 = vmul.f32 0.6931472, %v177_v33 }
  0x49   :  { %v125_v40 = vmul.f32 %v101_v37, %v302_v3  ;;  %v131_v41 = vadd.f32 %v101_v37, %v100_v34  ;;  %v80_v42 = vsel %vm79_vm2, %v77_v26, %v74_v35 }
  0x4a   :  { %v89_v44 = vsel %vm88_vm3, %v86_v31, %v83_v39  ;;  %v106_v45 = vadd.f32 %v104_v32, %v80_v42  ;;  %v112_v46 = vadd.f32 %v110_v27, %v80_v42 }
  0x4b   :  { %v127_v48 = vadd.f32 %v125_v40, %v124_v38  ;;  %v107_v49 = vadd.f32 %v105_v36, %v89_v44  ;;  %v113_v50 = vadd.f32 %v111_v28, %v89_v44  ;;  %133 = vst [vmem:[#allocation7 + $0x8] sm:$0xff] %v131_v41 }
  0x4c   :  { %v108_v51 = vmin.f32 %v106_v45, 100.0  ;;  %v114_v52 = vmin.f32 %v112_v46, 100.0 }
  0x4d   :  { %v109_v53 = vmin.f32 %v107_v49, 100.0  ;;  %v115_v54 = vmin.f32 %v113_v50, 100.0  ;;  %129 = vst [vmem:[#allocation7] sm:$0xff] %v127_v48 }
  0x4e   :  { %v116_v55 = vmul.f32 %v108_v51, %v300_v2  ;;  %v120_v56 = vmul.f32 %v118_v43, %v114_v52 }
  0x4f   :  { %v117_v57 = vmul.f32 %v109_v53, %v302_v3  ;;  %v121_v58 = vmul.f32 %v119_v47, %v115_v54 }
  0x50   :  { %v122_v59 = vadd.f32 %v120_v56, %v116_v55 }
  0x51   :  { %v123_v60 = vadd.f32 %v121_v58, %v117_v57 }
  0x53   :  { %v139_v61 = vadd.f32 %v123_v60, %v122_v59 }
  0x55   :  { %141 = vst [vmem:[#allocation7 + $0x18] sm:$0xff] %v139_v61 }
  0x56   :  { %233 = shalt.err (!%p230_p6)
}
  0x57   :  { %s234_s10 = scalar_lea.hbm %s330_s2, 512 }
  0x58   :  { %p235_p7 = scmp.ne.s32.totalorder %s330_s2, %s234_s10  ;;  %p238_p8 = scmp.lt.u32.totalorder %s234_s10, %s330_s2 }
  0x5a   :  { %p240_p9 = pnand %p238_p8, %p235_p7 }
  0x5c   :  { %243 = shalt.err (!%p240_p9)
}
  0x5d   :  { %153 = dma.vmem_to_hbm [thread:$0]  %s148_s6, 512, %s330_s2, [#allocation4], %s251_s19, %s251_s19, %s252_s20  }
  0x5e   :  { %248 = dma.done.wait [#allocation4], 512  }
  0x5f   :  { %249 = vsyncadd [#allocation4], 4294966784 }
  0x60   :  { %157 = vsyncpa [#allocation3], 1 }
  0x61   :  { %158 = vsyncpa [#allocation6], 1 }
  0x62   :  { %159 = vsyncpa [#allocation4], 1 }

</bundles_post_ra>
